<compile_context>
chip_gen: v6e
topology: v6e:2x2x1
jax: 0.10.0
libtpu: 0.0.40
codegen_flags: <defaults>
</compile_context>

<pallas_src>
import jax
import jax.numpy as jnp
from jax.experimental import pallas as pl
from jax.experimental.pallas import tpu as pltpu


# ---------------------------------------------------------------------------
# Parameter / buffer setup glue (pure JAX, mirrors the PyTorch helper).
# ---------------------------------------------------------------------------
def calculate_laplacian_with_self_loop(adj):
    n = adj.shape[0]
    matrix = adj + jnp.eye(n, dtype=adj.dtype)
    row_sum = matrix.sum(axis=1)
    d_inv_sqrt = jnp.power(row_sum, -0.5).reshape(-1)
    d_inv_sqrt = jnp.where(jnp.isinf(d_inv_sqrt), 0.0, d_inv_sqrt)
    d_mat_inv_sqrt = jnp.diag(d_inv_sqrt)
    return (matrix @ d_mat_inv_sqrt).T @ d_mat_inv_sqrt


def _round_up(x, m):
    return ((x + m - 1) // m) * m


def _pick_tile(num_nodes):
    # Pad N up to the tile instead of requiring the tile to divide N.
    # tile=128 measures ~29% of HBM roofline vs ~63%/85% at 256/512, so the
    # extra zero-padded FLOPs are cheaper than the worse DMA efficiency.
    n128 = _round_up(num_nodes, 128)
    if n128 >= 512:
        return 512
    if n128 >= 256:
        return 256
    return 128


# Working-set budget chosen so the group fits comfortably inside v7x's 64 MiB
# VMEM (and trivially inside v5e/v6e's 128 MiB); vmem limit raised above the
# 32 MiB default to accommodate the fused-batch slabs.
_VMEM_BUDGET_BYTES = 36 * 1024 * 1024
_VMEM_LIMIT_BYTES = 48 * 1024 * 1024


def _max_group_batch(tile, n_pad, d_pad, o_pad, op_bytes):
    """Largest batch-group whose working set fits the VMEM budget."""
    fixed = 2 * tile * tile * op_bytes          # L double buffer
    fixed += 2 * d_pad * o_pad * op_bytes       # resident W (count 2 bufs)
    per_b = (2 * n_pad * d_pad * op_bytes       # resident X (count 2 bufs)
             + tile * d_pad * 4                 # f32 accumulator
             + 2 * tile * o_pad * 4)            # f32 output double buffer
    avail = _VMEM_BUDGET_BYTES - fixed
    return max(1, avail // per_b)


# ---------------------------------------------------------------------------
# Kernel
# ---------------------------------------------------------------------------
def _gcn_kernel(l_ref, x_ref, w_ref, o_ref, acc_ref):
    # l_ref:   (tile, tile)          L row/col tile (each block DMA'd once)
    # x_ref:   (n_pad, bg*d_pad)     fully resident fused-batch X (DMA'd once)
    # w_ref:   (d_pad, o_pad)        resident weights
    # o_ref:   (bg, tile, o_pad)     output tile, written on last k step only
    # acc_ref: (tile, bg*d_pad) f32  contraction accumulator over k
    tile = l_ref.shape[0]
    d_pad = w_ref.shape[0]
    bg = o_ref.shape[0]
    k = pl.program_id(1)

    @pl.when(k == 0)
    def _init():
        acc_ref[...] = jnp.zeros_like(acc_ref)

    # First matmul: (tile, tile) @ (tile, bg*d_pad) -> wide RHS fills the MXU.
    x_blk = x_ref[pl.ds(pl.multiple_of(k * tile, tile), tile), :]
    acc_ref[...] += jnp.dot(l_ref[...], x_blk,
                            preferred_element_type=jnp.float32)

    @pl.when(k == pl.num_programs(1) - 1)
    def _finalize():
        w = w_ref[...]
        for b in range(bg):  # static loop; 128-aligned lane slices of acc
            ax_b = acc_ref[:, b * d_pad:(b + 1) * d_pad].astype(w.dtype)
            out_b = jnp.dot(ax_b, w, preferred_element_type=jnp.float32)
            o_ref[b, :, :] = jnp.tanh(out_b).astype(o_ref.dtype)


def _gcn_group_call(lap_p, x_grp, w_p, *, bg, tile, n_pad, d_pad, o_pad):
    grid_n = n_pad // tile
    op_bytes = jnp.dtype(lap_p.dtype).itemsize

    cost = pl.CostEstimate(
        flops=2 * n_pad * n_pad * bg * d_pad      # L @ X (fused batch)
        + 2 * bg * n_pad * d_pad * o_pad,          # ax @ W per batch
        transcendentals=bg * n_pad * o_pad,        # tanh
        bytes_accessed=(n_pad * n_pad * op_bytes        # L read once
                        + n_pad * bg * d_pad * op_bytes  # X read once
                        + d_pad * o_pad * op_bytes       # W read once
                        + bg * n_pad * o_pad * 4),       # output written once
    )

    return pl.pallas_call(
        _gcn_kernel,
        out_shape=jax.ShapeDtypeStruct((bg, n_pad, o_pad), jnp.float32),
        grid_spec=pltpu.PrefetchScalarGridSpec(
            num_scalar_prefetch=0,
            grid=(grid_n, grid_n),
            in_specs=[
                # L: (tile_i, tile_k) -- every block fetched exactly once.
                pl.BlockSpec((tile, tile), lambda i, k: (i, k)),
                # X: fully resident per group (constant index -> single DMA).
                pl.BlockSpec((n_pad, bg * d_pad), lambda i, k: (0, 0)),
                # W: fully resident.
                pl.BlockSpec((d_pad, o_pad), lambda i, k: (0, 0)),
            ],
            # Output block constant across k; written only on the last k step.
            out_specs=pl.BlockSpec((bg, tile, o_pad), lambda i, k: (0, i, 0)),
            scratch_shapes=[pltpu.VMEM((tile, bg * d_pad), jnp.float32)],
        ),
        compiler_params=pltpu.CompilerParams(
            dimension_semantics=("parallel", "arbitrary"),
            vmem_limit_bytes=_VMEM_LIMIT_BYTES,
        ),
        cost_estimate=cost,
    )(lap_p, x_grp, w_p)


# ---------------------------------------------------------------------------
# Wrapper
# ---------------------------------------------------------------------------
def gcn_encoder_forward(inputs, laplacian, weights, *,
                        operand_dtype=jnp.float32, max_group_batch=None):
    """inputs: (B, D, N); laplacian: (N, N); weights: (D, O) -> (B, N, O).

    operand_dtype=jnp.bfloat16 casts L/X/W to bf16 (f32 accumulation + f32
    tanh kept) — recommended on v5e/v6e/v7x when ~1e-2 tolerance is OK.
    """
    batch, input_dim, num_nodes = inputs.shape
    output_dim = weights.shape[1]

    tile = _pick_tile(num_nodes)
    n_pad = _round_up(num_nodes, tile)
    d_pad = _round_up(input_dim, 128)
    o_pad = _round_up(output_dim, 128)
    op_bytes = jnp.dtype(operand_dtype).itemsize

    # Lane-dense zero-padded operands (padding contributes exactly zero and
    # the padded output region is sliced off, so the result is exact).
    lap_p = jnp.pad(
        laplacian.astype(jnp.float32),
        ((0, n_pad - num_nodes), (0, n_pad - num_nodes)),
    ).astype(operand_dtype)
    # (B, D, N) -> (N, B, D), pad node & feature dims -> (N_pad, B, D_pad).
    x_nbd = jnp.pad(
        jnp.transpose(inputs.astype(jnp.float32), (2, 0, 1)),
        ((0, n_pad - num_nodes), (0, 0), (0, d_pad - input_dim)),
    ).astype(operand_dtype)
    w_p = jnp.pad(
        weights.astype(jnp.float32),
        ((0, d_pad - input_dim), (0, o_pad - output_dim)),
    ).astype(operand_dtype)

    # Size the fused-batch group to the VMEM budget (v7x has only 64 MiB).
    bg_cap = _max_group_batch(tile, n_pad, d_pad, o_pad, op_bytes)
    if max_group_batch is not None:
        bg_cap = min(bg_cap, max_group_batch)
    bg_cap = int(max(1, min(bg_cap, batch)))

    outs = []
    b0 = 0
    while b0 < batch:
        bg = min(bg_cap, batch - b0)
        # Fused-batch layout: (N_pad, bg*D_pad), batch b in lanes [b*Dp,(b+1)*Dp).
        x_grp = x_nbd[:, b0:b0 + bg, :].reshape(n_pad, bg * d_pad)
        outs.append(_gcn_group_call(lap_p, x_grp, w_p, bg=bg, tile=tile,
                                    n_pad=n_pad, d_pad=d_pad, o_pad=o_pad))
        b0 += bg
    out_p = outs[0] if len(outs) == 1 else jnp.concatenate(outs, axis=0)

    # Strip padding; output already in (B, N, O) order.
    return out_p[:, :num_nodes, :output_dim]


# ---------------------------------------------------------------------------
# Reference + test harness
# ---------------------------------------------------------------------------
def _reference_forward(inputs, laplacian, weights):
    """Pure-JAX reference mirroring the PyTorch forward exactly."""
    batch, input_dim, num_nodes = inputs.shape
    output_dim = weights.shape[1]
    x = jnp.transpose(inputs, (2, 0, 1)).reshape(num_nodes, batch * input_dim)
    ax = laplacian @ x
    ax = ax.reshape(num_nodes * batch, input_dim)
    out = jnp.tanh(ax @ weights)
    out = out.reshape(num_nodes, batch, output_dim)
    return jnp.transpose(out, (1, 0, 2))


def _make_case(key, num_nodes, batch, input_dim, output_dim):
    k_adj, k_x, k_w = jax.random.split(key, 3)
    adj = jax.random.uniform(k_adj, (num_nodes, num_nodes), dtype=jnp.float32)
    laplacian = calculate_laplacian_with_self_loop(adj)
    gain = 5.0 / 3.0  # tanh gain, xavier-uniform
    bound = gain * (6.0 / (input_dim + output_dim)) ** 0.5
    weights = jax.random.uniform(
        k_w, (input_dim, output_dim), minval=-bound, maxval=bound,
        dtype=jnp.float32,
    )
    inputs = jax.random.normal(k_x, (batch, input_dim, num_nodes),
                               dtype=jnp.float32)
    return inputs, laplacian, weights


if __name__ == "__main__":
    key = jax.random.PRNGKey(0)
    k1, k2 = jax.random.split(key)

    # Case 1: small shapes consistent with the module (single 128 tile).
    inputs, laplacian, weights = _make_case(
        k1, num_nodes=8, batch=2, input_dim=4, output_dim=32
    )
    out = gcn_encoder_forward(inputs, laplacian, weights)
    jax.block_until_ready(out)
    ref = _reference_forward(inputs, laplacian, weights)
    assert out.shape == (2, 8, 32)
    assert jnp.allclose(out, ref, atol=1e-5, rtol=1e-5)

    # Case 2: padding + multi-tile grid (N=300 -> tile=256, n_pad=512),
    # plus a forced small batch group to exercise the grouping path.
    inputs2, laplacian2, weights2 = _make_case(
        k2, num_nodes=300, batch=3, input_dim=5, output_dim=40
    )
    ref2 = _reference_forward(inputs2, laplacian2, weights2)

    out2 = gcn_encoder_forward(inputs2, laplacian2, weights2)
    jax.block_until_ready(out2)
    assert out2.shape == (3, 300, 40)
    assert jnp.allclose(out2, ref2, atol=2e-5, rtol=2e-5)

    out2g = gcn_encoder_forward(inputs2, laplacian2, weights2,
                                max_group_batch=2)
    jax.block_until_ready(out2g)
    assert jnp.allclose(out2g, ref2, atol=2e-5, rtol=2e-5)

    # Case 3: bf16 operand path (f32 accumulation) with loosened tolerance.
    out2b = gcn_encoder_forward(inputs2, laplacian2, weights2,
                                operand_dtype=jnp.bfloat16)
    jax.block_until_ready(out2b)
    assert jnp.allclose(out2b, ref2, atol=5e-2, rtol=5e-2)

    print("KERNEL_OK")
</pallas_src>

<mosaic_0001>
module attributes {stable_mosaic.version = 11 : i64} {
  func.func @_gcn_kernel(%arg0: i32, %arg1: i32, %arg2: memref<128x128xf32, #tpu.memory_space<vmem>>, %arg3: memref<128x256xf32, #tpu.memory_space<vmem>>, %arg4: memref<128x128xf32, #tpu.memory_space<vmem>>, %arg5: memref<2x128x128xf32, #tpu.memory_space<vmem>>, %arg6: memref<128x256xf32, #tpu.memory_space<vmem>>) attributes {dimension_semantics = [#tpu.dimension_semantics<parallel>, #tpu.dimension_semantics<arbitrary>], iteration_bounds = array<i64: 1, 1>, scalar_prefetch = 0 : i64, scratch_operands = 1 : i64, tpu.core_type = #tpu.core_type<tc>, window_params = [{transform_indices = @transform_0, window_bounds = array<i64: 128, 128>}, {pipeline_mode = #tpu.pipeline_mode<synchronous>, transform_indices = @transform_1, window_bounds = array<i64: 128, 256>}, {pipeline_mode = #tpu.pipeline_mode<synchronous>, transform_indices = @transform_2, window_bounds = array<i64: 128, 128>}, {transform_indices = @transform_3, window_bounds = array<i64: 2, 128, 128>}]} {
    %c0_i32 = arith.constant 0 : i32
    %0 = arith.cmpi eq, %arg1, %c0_i32 : i32
    %1 = arith.extui %0 : i1 to i32
    %c0_i32_0 = arith.constant 0 : i32
    %2 = arith.cmpi ne, %1, %c0_i32_0 : i32
    scf.if %2 {
      %cst_9 = arith.constant 0.000000e+00 : f32
      %15 = vector.broadcast %cst_9 : f32 to vector<128x256xf32>
      %c0_10 = arith.constant 0 : index
      %c0_11 = arith.constant 0 : index
      %16 = vector.load %arg6[%c0_10, %c0_11] : memref<128x256xf32, #tpu.memory_space<vmem>>, vector<128x256xf32>
      tpu.vector_store %arg6[%c0_10, %c0_11], %15 {strides = array<i32>} : memref<128x256xf32, #tpu.memory_space<vmem>>, vector<128x256xf32>,
    } else {
    }
    %c128_i32 = arith.constant 128 : i32
    %3 = arith.muli %arg1, %c128_i32 : i32
    %4 = tpu.assume_multiple %3, 128 : i32
    %5 = arith.index_cast %4 : i32 to index
    %c0 = arith.constant 0 : index
    %6 = vector.load %arg3[%5, %c0] : memref<128x256xf32, #tpu.memory_space<vmem>>, vector<128x256xf32>
    %c0_1 = arith.constant 0 : index
    %c0_2 = arith.constant 0 : index
    %7 = vector.load %arg6[%c0_1, %c0_2] : memref<128x256xf32, #tpu.memory_space<vmem>>, vector<128x256xf32>
    %c0_3 = arith.constant 0 : index
    %c0_4 = arith.constant 0 : index
    %8 = vector.load %arg2[%c0_3, %c0_4] : memref<128x128xf32, #tpu.memory_space<vmem>>, vector<128x128xf32>
    %cst = arith.constant dense<0.000000e+00> : vector<128x256xf32>
    %9 = tpu.matmul %8, %6, %cst {dimension_numbers = #tpu.dot_dimension_numbers<[1], [0], [0], [1], [0, 0, 1, 1], [], []>} : vector<128x128xf32>, vector<128x256xf32>, vector<128x256xf32> -> vector<128x256xf32>
    %10 = arith.addf %7, %9 : vector<128x256xf32>
    %c0_5 = arith.constant 0 : index
    %c0_6 = arith.constant 0 : index
    %11 = vector.load %arg6[%c0_5, %c0_6] : memref<128x256xf32, #tpu.memory_space<vmem>>, vector<128x256xf32>
    tpu.vector_store %arg6[%c0_5, %c0_6], %10 {strides = array<i32>} : memref<128x256xf32, #tpu.memory_space<vmem>>, vector<128x256xf32>,
    %c0_i32_7 = arith.constant 0 : i32
    %12 = arith.cmpi eq, %arg1, %c0_i32_7 : i32
    %13 = arith.extui %12 : i1 to i32
    %c0_i32_8 = arith.constant 0 : i32
    %14 = arith.cmpi ne, %13, %c0_i32_8 : i32
    scf.if %14 {
      %c0_9 = arith.constant 0 : index
      %c0_10 = arith.constant 0 : index
      %15 = vector.load %arg4[%c0_9, %c0_10] : memref<128x128xf32, #tpu.memory_space<vmem>>, vector<128x128xf32>
      %c0_11 = arith.constant 0 : index
      %c0_12 = arith.constant 0 : index
      %16 = vector.load %arg6[%c0_11, %c0_12] : memref<128x256xf32, #tpu.memory_space<vmem>>, vector<128x128xf32>
      %cst_13 = arith.constant dense<0.000000e+00> : vector<128x128xf32>
      %17 = tpu.matmul %16, %15, %cst_13 {dimension_numbers = #tpu.dot_dimension_numbers<[1], [0], [0], [1], [0, 0, 1, 1], [], []>} : vector<128x128xf32>, vector<128x128xf32>, vector<128x128xf32> -> vector<128x128xf32>
      %18 = math.tanh %17 : vector<128x128xf32>
      %c0_14 = arith.constant 0 : index
      %c0_15 = arith.constant 0 : index
      %c0_16 = arith.constant 0 : index
      %19 = vector.load %arg5[%c0_14, %c0_15, %c0_16] : memref<2x128x128xf32, #tpu.memory_space<vmem>>, vector<1x128x128xf32>
      %20 = vector.shape_cast %19 : vector<1x128x128xf32> to vector<128x128xf32>
      %21 = vector.shape_cast %18 : vector<128x128xf32> to vector<1x128x128xf32>
      tpu.vector_store %arg5[%c0_14, %c0_15, %c0_16], %21 {strides = array<i32>} : memref<2x128x128xf32, #tpu.memory_space<vmem>>, vector<1x128x128xf32>,
      %c0_17 = arith.constant 0 : index
      %c128 = arith.constant 128 : index
      %22 = vector.load %arg6[%c0_17, %c128] : memref<128x256xf32, #tpu.memory_space<vmem>>, vector<128x128xf32>
      %cst_18 = arith.constant dense<0.000000e+00> : vector<128x128xf32>
      %23 = tpu.matmul %22, %15, %cst_18 {dimension_numbers = #tpu.dot_dimension_numbers<[1], [0], [0], [1], [0, 0, 1, 1], [], []>} : vector<128x128xf32>, vector<128x128xf32>, vector<128x128xf32> -> vector<128x128xf32>
      %24 = math.tanh %23 : vector<128x128xf32>
      %c1 = arith.constant 1 : index
      %c0_19 = arith.constant 0 : index
      %c0_20 = arith.constant 0 : index
      %25 = vector.load %arg5[%c1, %c0_19, %c0_20] : memref<2x128x128xf32, #tpu.memory_space<vmem>>, vector<1x128x128xf32>
      %26 = vector.shape_cast %25 : vector<1x128x128xf32> to vector<128x128xf32>
      %27 = vector.shape_cast %24 : vector<128x128xf32> to vector<1x128x128xf32>
      tpu.vector_store %arg5[%c1, %c0_19, %c0_20], %27 {strides = array<i32>} : memref<2x128x128xf32, #tpu.memory_space<vmem>>, vector<1x128x128xf32>,
    } else {
    }
    return
  }
  func.func @transform_0(%arg0: i32, %arg1: i32) -> (i32, i32) {
    %c0_i32 = arith.constant 0 : i32
    return %arg0, %arg1 : i32, i32
  }
  func.func @transform_1(%arg0: i32, %arg1: i32) -> (i32, i32) {
    %c0_i32 = arith.constant 0 : i32
    %c0_i32_0 = arith.constant 0 : i32
    %c0_i32_1 = arith.constant 0 : i32
    return %c0_i32, %c0_i32_0 : i32, i32
  }
  func.func @transform_2(%arg0: i32, %arg1: i32) -> (i32, i32) {
    %c0_i32 = arith.constant 0 : i32
    %c0_i32_0 = arith.constant 0 : i32
    %c0_i32_1 = arith.constant 0 : i32
    return %c0_i32, %c0_i32_0 : i32, i32
  }
  func.func @transform_3(%arg0: i32, %arg1: i32) -> (i32, i32, i32) {
    %c0_i32 = arith.constant 0 : i32
    %c0_i32_0 = arith.constant 0 : i32
    %c0_i32_1 = arith.constant 0 : i32
    return %c0_i32, %arg0, %c0_i32_0 : i32, i32, i32
  }
}

</mosaic_0001>

<bundles_post_ra>
// kernel: tpu_custom_call.1
= control target key start
LH: loop header
LB: loop body
LE: loop exit
PB: predicated region body
PF: predicated region fallthrough
CT: control target
= control target key end

     0   :  { %8 = vsyncpa [#allocation4], 0  ;;  %s1323_s0 = inlined_call_operand.hbm [shape: f32[128,128], index: 0, kind: input, shape index: {}]   ;;  %s1324_s1 = inlined_call_operand.hbm [shape: f32[128,256], index: 1, kind: input, shape index: {}]   ;;  %s1325_s2 = inlined_call_operand.hbm [shape: f32[128,128], index: 2, kind: input, shape index: {}]   ;;  %s1326_s3 = inlined_call_operand.hbm [shape: f32[2,128,128], index: 3, kind: output, shape index: {}]  }
   0x1   :  { %9 = vsyncpa [#allocation7], 0 }
   0x2   :  { %10 = vsyncpa [#allocation5], 0  ;;  %s1164_s12 = smov [#allocation6]  }
   0x3   :  { %s28_s13 = sshll.u32 %s1164_s12, 4  ;;  %s29_s13 = int_to_ptr.vmem [resolvable:$true] %s28_s13 }
   0x4   :  { %s1086_s14 = scalar_lea.vmem %s29_s13, 4096  ;;  %p1091_p1 = scmp.lt.s32.totalorder %s29_s13, %s29_s13 }
   0x5   :  { %p1087_p0 = scmp.ne.s32.totalorder %s29_s13, %s1086_s14  ;;  %p1092_p2 = scmp.lt.s32.totalorder %s1086_s14, %s1086_s14 }
   0x7   :  { %p1093_p3 = por %p1092_p2, %p1091_p1 }
   0x9   :  { %p1094_p4 = pnand %p1093_p3, %p1087_p0 }
   0xb   :  { %1097 = shalt.err (!%p1094_p4)
}
   0xc   :  { %s1165_s15 = smov 256   ;;  %s1166_s16 = smov 16  }
   0xd   :  { %34 = dma.hbm_to_vmem [thread:$0]  %s1324_s1, 4096, %s29_s13, [#allocation7], %s1165_s15, %s1165_s15, %s1166_s16  }
   0xe   :  { %s1167_s19 = smov [#allocation3]  }
   0xf   :  { %s16_s20 = sshll.u32 %s1167_s19, 4  ;;  %s17_s20 = int_to_ptr.vmem [resolvable:$true] %s16_s20 }
  0x10   :  { %s1106_s21 = scalar_lea.vmem %s17_s20, 2048  ;;  %p1111_p6 = scmp.lt.s32.totalorder %s17_s20, %s17_s20 }
  0x11   :  { %p1107_p5 = scmp.ne.s32.totalorder %s17_s20, %s1106_s21  ;;  %p1112_p7 = scmp.lt.s32.totalorder %s1106_s21, %s1106_s21 }
  0x13   :  { %p1113_p8 = por %p1112_p7, %p1111_p6 }
  0x15   :  { %p1114_p9 = pnand %p1113_p8, %p1107_p5 }
  0x17   :  { %1117 = shalt.err (!%p1114_p9)
}
  0x18   :  { %s1168_s22 = smov 128   ;;  %s1169_s23 = smov 8  }
  0x19   :  { %22 = dma.hbm_to_vmem [thread:$0]  %s1323_s0, 2048, %s17_s20, [#allocation4], %s1168_s22, %s1168_s22, %s1169_s23  }
  0x1a   :  { %s1170_s1 = smov [#allocation8]  }
  0x1b   :  { %s40_s26 = sshll.u32 %s1170_s1, 4  ;;  %s41_s26 = int_to_ptr.vmem [resolvable:$true] %s40_s26 }
  0x1c   :  { %s1126_s27 = scalar_lea.vmem %s41_s26, 2048  ;;  %p1131_p11 = scmp.lt.s32.totalorder %s41_s26, %s41_s26 }
  0x1d   :  { %p1127_p10 = scmp.ne.s32.totalorder %s41_s26, %s1126_s27  ;;  %p1132_p12 = scmp.lt.s32.totalorder %s1126_s27, %s1126_s27 }
  0x1f   :  { %p1133_p13 = por %p1132_p12, %p1131_p11 }
  0x21   :  { %p1134_p0 = pnand %p1133_p13, %p1127_p10 }
  0x23   :  { %1137 = shalt.err (!%p1134_p0)
}
  0x24   :  { %46 = dma.hbm_to_vmem [thread:$0]  %s1325_s2, 2048, %s41_s26, [#allocation7], %s1168_s22, %s1168_s22, %s1169_s23  }
  0x25   :  { %1158 = dma.done.wait [#allocation4], 2048  }
  0x26   :  { %1159 = vsyncadd [#allocation4], 4294965248 }
  0x27   :  { %1160 = dma.done.wait [#allocation7], 6144  }
  0x28   :  { %1161 = vsyncadd [#allocation7], 4294961152  ;;  %v1171_v0 = vmov 0.0   ;;  %v129_v1 = vld [vmem:[#allocation6 + $0xf8] sm:$0xff]  ;;  %v128_v2 = vld [vmem:[#allocation6 + $0xf0] sm:$0xff]  ;;  %s1172_s0 = smov [#allocation9]  }
  0x29   :  { %242 = vmatprep.mubr.f32.mxu0 %v1171_v0  ;;  %v127_v3 = vld [vmem:[#allocation6 + $0xe8] sm:$0xff]  ;;  %178 = vmatprep.subr.mxu0 %v129_v1  ;;  %v126_v4 = vld [vmem:[#allocation6 + $0xe0] sm:$0xff]  ;;  %v125_v5 = vld [vmem:[#allocation6 + $0xd8] sm:$0xff]  ;;  %s814_s2 = sshll.u32 %s1172_s0, 4  ;;  %s815_s2 = int_to_ptr.vmem [resolvable:$true] %s814_s2 }
  0x2a   :  { %179 = vmatpush1.msra.mxu0 %v128_v2  ;;  %v124_v6 = vld [vmem:[#allocation6 + $0xd0] sm:$0xff]  ;;  %v123_v7 = vld [vmem:[#allocation6 + $0xc8] sm:$0xff]  ;;  %v122_v8 = vld [vmem:[#allocation6 + $0xc0] sm:$0xff]  ;;  %s1138_s30 = scalar_lea.vmem %s815_s2, 4096  ;;  %p1143_p2 = scmp.lt.s32.totalorder %s815_s2, %s815_s2 }
  0x2b   :  { %180 = vmatprep.subr.mxu0 %v127_v3  ;;  %v121_v9 = vld [vmem:[#allocation6 + $0xb8] sm:$0xff]  ;;  %v120_v10 = vld [vmem:[#allocation6 + $0xb0] sm:$0xff]  ;;  %v119_v11 = vld [vmem:[#allocation6 + $0xa8] sm:$0xff]  ;;  %p1139_p1 = scmp.ne.s32.totalorder %s815_s2, %s1138_s30  ;;  %p1144_p3 = scmp.lt.s32.totalorder %s1138_s30, %s1138_s30 }
  0x2c   :  { %181 = vmatpush1.msra.mxu0 %v126_v4  ;;  %v118_v12 = vld [vmem:[#allocation6 + $0xa0] sm:$0xff]  ;;  %v117_v13 = vld [vmem:[#allocation6 + $0x98] sm:$0xff]  ;;  %v116_v14 = vld [vmem:[#allocation6 + $0x90] sm:$0xff] }
  0x2d   :  { %182 = vmatprep.subr.mxu0 %v125_v5  ;;  %v115_v15 = vld [vmem:[#allocation6 + $0x88] sm:$0xff]  ;;  %v114_v16 = vld [vmem:[#allocation6 + $0x80] sm:$0xff]  ;;  %v113_v17 = vld [vmem:[#allocation6 + $0x78] sm:$0xff]  ;;  %p1145_p4 = por %p1144_p3, %p1143_p2 }
  0x2e   :  { %183 = vmatpush1.msra.mxu0 %v124_v6  ;;  %v112_v18 = vld [vmem:[#allocation6 + $0x70] sm:$0xff]  ;;  %v111_v19 = vld [vmem:[#allocation6 + $0x68] sm:$0xff]  ;;  %v1209_v20 = vld [vmem:[#allocation8 + $0x78] sm:$0xff] }
  0x2f   :  { %184 = vmatprep.subr.mxu0 %v123_v7  ;;  %v1211_v21 = vld [vmem:[#allocation8 + $0x70] sm:$0xff]  ;;  %v110_v22 = vld [vmem:[#allocation6 + $0x60] sm:$0xff]  ;;  %893 = vmatprep.subr.mxu1 %v1209_v20  ;;  %v109_v23 = vld [vmem:[#allocation6 + $0x58] sm:$0xff]  ;;  %p1146_p5 = pnand %p1145_p4, %p1139_p1 }
  0x30   :  { %185 = vmatpush1.msra.mxu0 %v122_v8  ;;  %894 = vmatpush3.msra.mxu1 %v1209_v20  ;;  %v1215_v24 = vld [vmem:[#allocation8 + $0x68] sm:$0xff]  ;;  %v108_v25 = vld [vmem:[#allocation6 + $0x50] sm:$0xff]  ;;  %v1219_v27 = vld [vmem:[#allocation8 + $0x60] sm:$0xff] }
  0x31   :  { %186 = vmatprep.subr.mxu0 %v121_v9  ;;  %895 = vmatprep.subr.mxu1 %v1211_v21  ;;  %v107_v26 = vld [vmem:[#allocation6 + $0x48] sm:$0xff]  ;;  %v106_v28 = vld [vmem:[#allocation6 + $0x40] sm:$0xff]  ;;  %v105_v29 = vld [vmem:[#allocation6 + $0x38] sm:$0xff] }
  0x32   :  { %187 = vmatpush1.msra.mxu0 %v120_v10  ;;  %896 = vmatpush3.msra.mxu1 %v1211_v21  ;;  %v1223_v30 = vld [vmem:[#allocation8 + $0x58] sm:$0xff]  ;;  %v104_v31 = vld [vmem:[#allocation6 + $0x30] sm:$0xff]  ;;  %v103_v32 = vld [vmem:[#allocation6 + $0x28] sm:$0xff] }
  0x33   :  { %188 = vmatprep.subr.mxu0 %v119_v11  ;;  %897 = vmatprep.subr.mxu1 %v1215_v24  ;;  %v1227_v33 = vld [vmem:[#allocation8 + $0x50] sm:$0xff]  ;;  %v102_v34 = vld [vmem:[#allocation6 + $0x20] sm:$0xff]  ;;  %v101_v35 = vld [vmem:[#allocation6 + $0x18] sm:$0xff] }
  0x34   :  { %189 = vmatpush1.msra.mxu0 %v118_v12  ;;  %898 = vmatpush3.msra.mxu1 %v1215_v24  ;;  %v1231_v36 = vld [vmem:[#allocation8 + $0x48] sm:$0xff]  ;;  %v100_v37 = vld [vmem:[#allocation6 + $0x10] sm:$0xff]  ;;  %v1235_v39 = vld [vmem:[#allocation8 + $0x40] sm:$0xff] }
  0x35   :  { %190 = vmatprep.subr.mxu0 %v117_v13  ;;  %899 = vmatprep.subr.mxu1 %v1219_v27  ;;  %v99_v38 = vld [vmem:[#allocation6 + $0x8] sm:$0xff]  ;;  %v98_v40 = vld [vmem:[#allocation6] sm:$0xff]  ;;  %v1239_v42 = vld [vmem:[#allocation8 + $0x38] sm:$0xff] }
  0x36   :  { %191 = vmatpush1.msra.mxu0 %v116_v14  ;;  %900 = vmatpush3.msra.mxu1 %v1219_v27  ;;  %v162_v41 = vld [vmem:[#allocation3] sm:$0xff]  ;;  %v1243_v43 = vld [vmem:[#allocation8 + $0x30] sm:$0xff]  ;;  %v163_v44 = vld [vmem:[#allocation3 + $0x8] sm:$0xff] }
  0x37   :  { %192 = vmatprep.subr.mxu0 %v115_v15  ;;  %901 = vmatprep.subr.mxu1 %v1223_v30  ;;  %v1248_v45 = vld [vmem:[#allocation8 + $0x28] sm:$0xff]  ;;  %v1252_v46 = vld [vmem:[#allocation8 + $0x20] sm:$0xff]  ;;  %v164_v47 = vld [vmem:[#allocation3 + $0x10] sm:$0xff] }
  0x38   :  { %193 = vmatpush1.msra.mxu0 %v114_v16  ;;  %902 = vmatpush3.msra.mxu1 %v1223_v30  ;;  %v1257_v48 = vld [vmem:[#allocation8 + $0x18] sm:$0xff]  ;;  %v1261_v49 = vld [vmem:[#allocation8 + $0x10] sm:$0xff]  ;;  %v166_v51 = vld [vmem:[#allocation3 + $0x20] sm:$0xff] }
  0x39   :  { %194 = vmatprep.subr.mxu0 %v113_v17  ;;  %903 = vmatprep.subr.mxu1 %v1227_v33  ;;  %v165_v50 = vld [vmem:[#allocation3 + $0x18] sm:$0xff]  ;;  %v167_v52 = vld [vmem:[#allocation3 + $0x28] sm:$0xff]  ;;  %v168_v53 = vld [vmem:[#allocation3 + $0x30] sm:$0xff] }
  0x3a   :  { %195 = vmatpush1.msra.mxu0 %v112_v18  ;;  %904 = vmatpush3.msra.mxu1 %v1227_v33  ;;  %v169_v54 = vld [vmem:[#allocation3 + $0x38] sm:$0xff]  ;;  %v170_v55 = vld [vmem:[#allocation3 + $0x40] sm:$0xff]  ;;  %v171_v56 = vld [vmem:[#allocation3 + $0x48] sm:$0xff] }
  0x3b   :  { %196 = vmatprep.subr.mxu0 %v111_v19  ;;  %905 = vmatprep.subr.mxu1 %v1231_v36  ;;  %v172_v57 = vld [vmem:[#allocation3 + $0x50] sm:$0xff]  ;;  %v173_v58 = vld [vmem:[#allocation3 + $0x58] sm:$0xff]  ;;  %v174_v59 = vld [vmem:[#allocation3 + $0x60] sm:$0xff] }
  0x3c   :  { %197 = vmatpush1.msra.mxu0 %v110_v22  ;;  %906 = vmatpush3.msra.mxu1 %v1231_v36  ;;  %v175_v60 = vld [vmem:[#allocation3 + $0x68] sm:$0xff]  ;;  %v176_v61 = vld [vmem:[#allocation3 + $0x70] sm:$0xff]  ;;  %v177_v62 = vld [vmem:[#allocation3 + $0x78] sm:$0xff] }
  0x3d   :  { %198 = vmatprep.subr.mxu0 %v109_v23  ;;  %907 = vmatprep.subr.mxu1 %v1235_v39  ;;  %v407_v63 = vld [vmem:[#allocation8 + $0x8] sm:$0xff]  ;;  %v406_v1 = vld [vmem:[#allocation8] sm:$0xff] }
  0x3e   :  { %199 = vmatpush1.msra.mxu0 %v108_v25  ;;  %908 = vmatpush3.msra.mxu1 %v1235_v39 }
  0x3f   :  { %200 = vmatprep.subr.mxu0 %v107_v26  ;;  %909 = vmatprep.subr.mxu1 %v1239_v42 }
  0x40   :  { %201 = vmatpush1.msra.mxu0 %v106_v28  ;;  %910 = vmatpush3.msra.mxu1 %v1239_v42 }
  0x41   :  { %202 = vmatprep.subr.mxu0 %v105_v29  ;;  %911 = vmatprep.subr.mxu1 %v1243_v43 }
  0x42   :  { %203 = vmatpush1.msra.mxu0 %v104_v31  ;;  %912 = vmatpush3.msra.mxu1 %v1243_v43 }
  0x43   :  { %204 = vmatprep.subr.mxu0 %v103_v32  ;;  %913 = vmatprep.subr.mxu1 %v1248_v45 }
  0x44   :  { %205 = vmatpush1.msra.mxu0 %v102_v34  ;;  %914 = vmatpush3.msra.mxu1 %v1248_v45 }
  0x45   :  { %206 = vmatprep.subr.mxu0 %v101_v35  ;;  %915 = vmatprep.subr.mxu1 %v1252_v46 }
  0x46   :  { %207 = vmatpush1.msra.mxu0 %v100_v37  ;;  %916 = vmatpush3.msra.mxu1 %v1252_v46 }
  0x47   :  { %208 = vmatprep.subr.mxu0 %v99_v38  ;;  %917 = vmatprep.subr.mxu1 %v1257_v48 }
  0x48   :  { %209 = vmatpush1.msra.mxu0 %v98_v40  ;;  %918 = vmatpush3.msra.mxu1 %v1257_v48 }
  0x49   :  { %243 = vmatmul.mubr.f32.vlgmr.msra.gmra.mxu0 %v162_v41  ;;  %919 = vmatprep.subr.mxu1 %v1261_v49 }
  0x4a   :  { %248 = vmatprep.mubr.f32.mxu0 %v1171_v0  ;;  %920 = vmatpush3.msra.mxu1 %v1261_v49 }
  0x4b   :  { %921 = vmatprep.subr.mxu1 %v407_v63 }
  0x4c   :  { %922 = vmatpush3.msra.mxu1 %v407_v63 }
  0x4d   :  { %249 = vmatmul.mubr.f32.gmra.mxu0 %v163_v44  ;;  %923 = vmatprep.subr.mxu1 %v406_v1 }
  0x4e   :  { %254 = vmatprep.mubr.f32.mxu0 %v1171_v0  ;;  %924 = vmatpush3.msra.mxu1 %v406_v1 }
  0x4f   :  { %949 = vmatprep.subr.mxu1 %v1209_v20 }
  0x51   :  { %255 = vmatmul.mubr.f32.gmra.mxu0 %v164_v47 }
  0x52   :  { %260 = vmatprep.mubr.f32.mxu0 %v1171_v0 }
  0x55   :  { %261 = vmatmul.mubr.f32.gmra.mxu0 %v165_v50 }
  0x56   :  { %266 = vmatprep.mubr.f32.mxu0 %v1171_v0 }
  0x59   :  { %267 = vmatmul.mubr.f32.gmra.mxu0 %v166_v51 }
  0x5a   :  { %272 = vmatprep.mubr.f32.mxu0 %v1171_v0 }
  0x5d   :  { %273 = vmatmul.mubr.f32.gmra.mxu0 %v167_v52 }
  0x5e   :  { %278 = vmatprep.mubr.f32.mxu0 %v1171_v0 }
  0x61   :  { %279 = vmatmul.mubr.f32.gmra.mxu0 %v168_v53 }
  0x62   :  { %284 = vmatprep.mubr.f32.mxu0 %v1171_v0 }
  0x65   :  { %285 = vmatmul.mubr.f32.gmra.mxu0 %v169_v54 }
  0x66   :  { %290 = vmatprep.mubr.f32.mxu0 %v1171_v0 }
  0x69   :  { %291 = vmatmul.mubr.f32.gmra.mxu0 %v170_v55 }
  0x6a   :  { %296 = vmatprep.mubr.f32.mxu0 %v1171_v0 }
  0x6d   :  { %297 = vmatmul.mubr.f32.gmra.mxu0 %v171_v56 }
  0x6e   :  { %302 = vmatprep.mubr.f32.mxu0 %v1171_v0 }
  0x71   :  { %303 = vmatmul.mubr.f32.gmra.mxu0 %v172_v57 }
  0x72   :  { %308 = vmatprep.mubr.f32.mxu0 %v1171_v0 }
  0x75   :  { %309 = vmatmul.mubr.f32.gmra.mxu0 %v173_v58 }
  0x76   :  { %314 = vmatprep.mubr.f32.mxu0 %v1171_v0 }
  0x79   :  { %315 = vmatmul.mubr.f32.gmra.mxu0 %v174_v59 }
  0x7a   :  { %320 = vmatprep.mubr.f32.mxu0 %v1171_v0 }
  0x7d   :  { %321 = vmatmul.mubr.f32.gmra.mxu0 %v175_v60 }
  0x7e   :  { %326 = vmatprep.mubr.f32.mxu0 %v1171_v0 }
  0x81   :  { %327 = vmatmul.mubr.f32.gmra.mxu0 %v176_v61 }
  0x82   :  { %332 = vmatprep.mubr.f32.mxu0 %v1171_v0 }
  0x85   :  { %333 = vmatmul.mubr.f32.gmra.mxu0 %v177_v62 }
 0x109   :  { %v244_v2 = vpop.f32.mrf.mxu0 }
 0x10a   :  { %925 = vmatprep.mubr.f32.mxu1 %v244_v2 }
 0x10b   :  { %v1281_v3 = vpop.f32.mrf.mxu0 }
 0x10d   :  { %v250_v4 = vpop.f32.mrf.mxu0 }
 0x10e   :  { %926 = vmatmul.mubr.f32.vlgmr.msra.gmra.mxu1 %v250_v4 }
 0x10f   :  { %v1283_v5 = vpop.f32.mrf.mxu0  ;;  %950 = vmatpush3.msra.mxu1 %v1209_v20 }
 0x110   :  { %951 = vmatprep.subr.mxu1 %v1211_v21 }
 0x111   :  { %v256_v0 = vpop.f32.mrf.mxu0  ;;  %952 = vmatpush3.msra.mxu1 %v1211_v21 }
 0x112   :  { %928 = vmatprep.mubr.f32.mxu1 %v256_v0  ;;  %953 = vmatprep.subr.mxu1 %v1215_v24 }
 0x113   :  { %v1289_v6 = vpop.f32.mrf.mxu0  ;;  %954 = vmatpush3.msra.mxu1 %v1215_v24 }
 0x114   :  { %955 = vmatprep.subr.mxu1 %v1219_v27 }
 0x115   :  { %v262_v7 = vpop.f32.mrf.mxu0  ;;  %956 = vmatpush3.msra.mxu1 %v1219_v27 }
 0x116   :  { %929 = vmatmul.mubr.f32.gmra.mxu1 %v262_v7  ;;  %957 = vmatprep.subr.mxu1 %v1223_v30 }
 0x117   :  { %v264_v8 = vpop.f32.mrf.mxu0  ;;  %958 = vmatpush3.msra.mxu1 %v1223_v30 }
 0x118   :  { %959 = vmatprep.subr.mxu1 %v1227_v33 }
 0x119   :  { %v268_v9 = vpop.f32.mrf.mxu0  ;;  %960 = vmatpush3.msra.mxu1 %v1227_v33 }
 0x11a   :  { %931 = vmatprep.mubr.f32.mxu1 %v268_v9  ;;  %961 = vmatprep.subr.mxu1 %v1231_v36 }
 0x11b   :  { %v270_v10 = vpop.f32.mrf.mxu0  ;;  %962 = vmatpush3.msra.mxu1 %v1231_v36 }
 0x11c   :  { %963 = vmatprep.subr.mxu1 %v1235_v39 }
 0x11d   :  { %v274_v11 = vpop.f32.mrf.mxu0  ;;  %964 = vmatpush3.msra.mxu1 %v1235_v39 }
 0x11e   :  { %932 = vmatmul.mubr.f32.gmra.mxu1 %v274_v11  ;;  %965 = vmatprep.subr.mxu1 %v1239_v42 }
 0x11f   :  { %v276_v12 = vpop.f32.mrf.mxu0  ;;  %966 = vmatpush3.msra.mxu1 %v1239_v42 }
 0x120   :  { %967 = vmatprep.subr.mxu1 %v1243_v43 }
 0x121   :  { %v280_v13 = vpop.f32.mrf.mxu0  ;;  %968 = vmatpush3.msra.mxu1 %v1243_v43 }
 0x122   :  { %934 = vmatprep.mubr.f32.mxu1 %v280_v13  ;;  %969 = vmatprep.subr.mxu1 %v1248_v45 }
 0x123   :  { %v282_v14 = vpop.f32.mrf.mxu0  ;;  %970 = vmatpush3.msra.mxu1 %v1248_v45 }
 0x124   :  { %971 = vmatprep.subr.mxu1 %v1252_v46 }
 0x125   :  { %v286_v15 = vpop.f32.mrf.mxu0  ;;  %972 = vmatpush3.msra.mxu1 %v1252_v46 }
 0x126   :  { %935 = vmatmul.mubr.f32.gmra.mxu1 %v286_v15  ;;  %973 = vmatprep.subr.mxu1 %v1257_v48 }
 0x127   :  { %v288_v16 = vpop.f32.mrf.mxu0  ;;  %974 = vmatpush3.msra.mxu1 %v1257_v48 }
 0x128   :  { %975 = vmatprep.subr.mxu1 %v1261_v49 }
 0x129   :  { %v292_v17 = vpop.f32.mrf.mxu0  ;;  %976 = vmatpush3.msra.mxu1 %v1261_v49 }
 0x12a   :  { %937 = vmatprep.mubr.f32.mxu1 %v292_v17  ;;  %977 = vmatprep.subr.mxu1 %v407_v63 }
 0x12b   :  { %v294_v18 = vpop.f32.mrf.mxu0  ;;  %978 = vmatpush3.msra.mxu1 %v407_v63 }
 0x12c   :  { %979 = vmatprep.subr.mxu1 %v406_v1 }
 0x12d   :  { %v298_v19 = vpop.f32.mrf.mxu0  ;;  %980 = vmatpush3.msra.mxu1 %v406_v1 }
 0x12e   :  { %938 = vmatmul.mubr.f32.gmra.mxu1 %v298_v19 }
 0x12f   :  { %v300_v20 = vpop.f32.mrf.mxu0 }
 0x131   :  { %v304_v21 = vpop.f32.mrf.mxu0 }
 0x132   :  { %940 = vmatprep.mubr.f32.mxu1 %v304_v21 }
 0x133   :  { %v306_v22 = vpop.f32.mrf.mxu0 }
 0x135   :  { %v310_v23 = vpop.f32.mrf.mxu0 }
 0x136   :  { %941 = vmatmul.mubr.f32.gmra.mxu1 %v310_v23 }
 0x137   :  { %v312_v24 = vpop.f32.mrf.mxu0 }
 0x139   :  { %v316_v25 = vpop.f32.mrf.mxu0 }
 0x13a   :  { %943 = vmatprep.mubr.f32.mxu1 %v316_v25 }
 0x13b   :  { %v318_v26 = vpop.f32.mrf.mxu0 }
 0x13d   :  { %v322_v27 = vpop.f32.mrf.mxu0 }
 0x13e   :  { %944 = vmatmul.mubr.f32.gmra.mxu1 %v322_v27 }
 0x13f   :  { %v324_v28 = vpop.f32.mrf.mxu0 }
 0x141   :  { %v328_v29 = vpop.f32.mrf.mxu0 }
 0x142   :  { %946 = vmatprep.mubr.f32.mxu1 %v328_v29 }
 0x143   :  { %v330_v30 = vpop.f32.mrf.mxu0 }
 0x145   :  { %v334_v31 = vpop.f32.mrf.mxu0 }
 0x146   :  { %947 = vmatmul.mubr.f32.gmra.mxu1 %v334_v31 }
 0x147   :  { %981 = vmatprep.mubr.f32.mxu1 %v1281_v3  ;;  %v336_v32 = vpop.f32.mrf.mxu0 }
 0x14a   :  { %982 = vmatmul.mubr.f32.vlgmr.msra.gmra.mxu1 %v1283_v5 }
 0x14b   :  { %984 = vmatprep.mubr.f32.mxu1 %v1289_v6 }
 0x14e   :  { %985 = vmatmul.mubr.f32.gmra.mxu1 %v264_v8 }
 0x14f   :  { %987 = vmatprep.mubr.f32.mxu1 %v270_v10 }
 0x152   :  { %988 = vmatmul.mubr.f32.gmra.mxu1 %v276_v12 }
 0x153   :  { %990 = vmatprep.mubr.f32.mxu1 %v282_v14 }
 0x156   :  { %991 = vmatmul.mubr.f32.gmra.mxu1 %v288_v16 }
 0x157   :  { %993 = vmatprep.mubr.f32.mxu1 %v294_v18 }
 0x15a   :  { %994 = vmatmul.mubr.f32.gmra.mxu1 %v300_v20 }
 0x15b   :  { %996 = vmatprep.mubr.f32.mxu1 %v306_v22 }
 0x15e   :  { %997 = vmatmul.mubr.f32.gmra.mxu1 %v312_v24 }
 0x15f   :  { %999 = vmatprep.mubr.f32.mxu1 %v318_v26 }
 0x162   :  { %1000 = vmatmul.mubr.f32.gmra.mxu1 %v324_v28 }
 0x163   :  { %1002 = vmatprep.mubr.f32.mxu1 %v330_v30 }
 0x166   :  { %1003 = vmatmul.mubr.f32.gmra.mxu1 %v336_v32 }
 0x1ce   :  { %v927_v33 = vpop.f32.mrf.mxu1 }
 0x1cf   :  { %1014 = vtanh.f32 %v927_v33 }
 0x1d0   :  { %v504_v34 = vpop.f32.mrf.mxu1 }
 0x1d1   :  { %1016 = vtanh.f32 %v504_v34 }
 0x1d6   :  { %v930_v35 = vpop.f32.mrf.mxu1 }
 0x1d7   :  { %1018 = vtanh.f32 %v930_v35 }
 0x1d8   :  { %v514_v36 = vpop.f32.mrf.mxu1 }
 0x1d9   :  { %1020 = vtanh.f32 %v514_v36 }
 0x1dc   :  { %v1015_v37 = vpop.eup %1014 }
 0x1dd   :  { %600 = vst [vmem:[#allocation9 + $0x8] sm:$0xff] %v1015_v37 }
 0x1de   :  { %v1017_v38 = vpop.eup %1016  ;;  %v933_v39 = vpop.f32.mrf.mxu1 }
 0x1df   :  { %599 = vst [vmem:[#allocation9] sm:$0xff] %v1017_v38  ;;  %1022 = vtanh.f32 %v933_v39 }
 0x1e0   :  { %v524_v40 = vpop.f32.mrf.mxu1 }
 0x1e1   :  { %1024 = vtanh.f32 %v524_v40 }
 0x1e4   :  { %v1019_v41 = vpop.eup %1018 }
 0x1e5   :  { %602 = vst [vmem:[#allocation9 + $0x18] sm:$0xff] %v1019_v41 }
 0x1e6   :  { %v1021_v42 = vpop.eup %1020  ;;  %v936_v43 = vpop.f32.mrf.mxu1 }
 0x1e7   :  { %601 = vst [vmem:[#allocation9 + $0x10] sm:$0xff] %v1021_v42  ;;  %1026 = vtanh.f32 %v936_v43 }
 0x1e8   :  { %v534_v44 = vpop.f32.mrf.mxu1 }
 0x1e9   :  { %1028 = vtanh.f32 %v534_v44 }
 0x1ec   :  { %v1023_v45 = vpop.eup %1022 }
 0x1ed   :  { %604 = vst [vmem:[#allocation9 + $0x28] sm:$0xff] %v1023_v45 }
 0x1ee   :  { %v1025_v46 = vpop.eup %1024  ;;  %v939_v47 = vpop.f32.mrf.mxu1 }
 0x1ef   :  { %603 = vst [vmem:[#allocation9 + $0x20] sm:$0xff] %v1025_v46  ;;  %1030 = vtanh.f32 %v939_v47 }
 0x1f0   :  { %v544_v48 = vpop.f32.mrf.mxu1 }
 0x1f1   :  { %1032 = vtanh.f32 %v544_v48 }
 0x1f4   :  { %v1027_v49 = vpop.eup %1026 }
 0x1f5   :  { %606 = vst [vmem:[#allocation9 + $0x38] sm:$0xff] %v1027_v49 }
 0x1f6   :  { %v1029_v50 = vpop.eup %1028  ;;  %v942_v51 = vpop.f32.mrf.mxu1 }
 0x1f7   :  { %605 = vst [vmem:[#allocation9 + $0x30] sm:$0xff] %v1029_v50  ;;  %1034 = vtanh.f32 %v942_v51 }
 0x1f8   :  { %v554_v52 = vpop.f32.mrf.mxu1 }
 0x1f9   :  { %1036 = vtanh.f32 %v554_v52 }
 0x1fc   :  { %v1031_v53 = vpop.eup %1030 }
 0x1fd   :  { %608 = vst [vmem:[#allocation9 + $0x48] sm:$0xff] %v1031_v53 }
 0x1fe   :  { %v1033_v54 = vpop.eup %1032  ;;  %v945_v55 = vpop.f32.mrf.mxu1 }
 0x1ff   :  { %607 = vst [vmem:[#allocation9 + $0x40] sm:$0xff] %v1033_v54  ;;  %1038 = vtanh.f32 %v945_v55 }
 0x200   :  { %v564_v56 = vpop.f32.mrf.mxu1 }
 0x201   :  { %1040 = vtanh.f32 %v564_v56 }
 0x204   :  { %v1035_v57 = vpop.eup %1034 }
 0x205   :  { %610 = vst [vmem:[#allocation9 + $0x58] sm:$0xff] %v1035_v57 }
 0x206   :  { %v1037_v58 = vpop.eup %1036  ;;  %v948_v59 = vpop.f32.mrf.mxu1 }
 0x207   :  { %609 = vst [vmem:[#allocation9 + $0x50] sm:$0xff] %v1037_v58  ;;  %1042 = vtanh.f32 %v948_v59 }
 0x208   :  { %v574_v60 = vpop.f32.mrf.mxu1 }
 0x209   :  { %1044 = vtanh.f32 %v574_v60 }
 0x20a   :  { %v983_v61 = vpop.f32.mrf.mxu1 }
 0x20b   :  { %1046 = vtanh.f32 %v983_v61 }
 0x20c   :  { %v1039_v62 = vpop.eup %1038  ;;  %v697_v63 = vpop.f32.mrf.mxu1 }
 0x20d   :  { %612 = vst [vmem:[#allocation9 + $0x68] sm:$0xff] %v1039_v62  ;;  %1048 = vtanh.f32 %v697_v63 }
 0x20e   :  { %v1041_v1 = vpop.eup %1040  ;;  %v986_v2 = vpop.f32.mrf.mxu1 }
 0x20f   :  { %611 = vst [vmem:[#allocation9 + $0x60] sm:$0xff] %v1041_v1  ;;  %1050 = vtanh.f32 %v986_v2 }
 0x210   :  { %v707_v3 = vpop.f32.mrf.mxu1 }
 0x211   :  { %1052 = vtanh.f32 %v707_v3 }
 0x212   :  { %v989_v4 = vpop.f32.mrf.mxu1 }
 0x213   :  { %1054 = vtanh.f32 %v989_v4 }
 0x214   :  { %v1043_v5 = vpop.eup %1042  ;;  %v717_v0 = vpop.f32.mrf.mxu1 }
 0x215   :  { %614 = vst [vmem:[#allocation9 + $0x78] sm:$0xff] %v1043_v5  ;;  %1056 = vtanh.f32 %v717_v0 }
 0x216   :  { %v1045_v6 = vpop.eup %1044  ;;  %v992_v7 = vpop.f32.mrf.mxu1 }
 0x217   :  { %613 = vst [vmem:[#allocation9 + $0x70] sm:$0xff] %v1045_v6  ;;  %1058 = vtanh.f32 %v992_v7 }
 0x218   :  { %v1047_v8 = vpop.eup %1046  ;;  %v727_v9 = vpop.f32.mrf.mxu1 }
 0x219   :  { %794 = vst [vmem:[#allocation9 + $0x88] sm:$0xff] %v1047_v8  ;;  %1060 = vtanh.f32 %v727_v9 }
 0x21a   :  { %v1049_v10 = vpop.eup %1048  ;;  %v995_v11 = vpop.f32.mrf.mxu1 }
 0x21b   :  { %793 = vst [vmem:[#allocation9 + $0x80] sm:$0xff] %v1049_v10  ;;  %1062 = vtanh.f32 %v995_v11 }
 0x21c   :  { %v1051_v12 = vpop.eup %1050  ;;  %v737_v13 = vpop.f32.mrf.mxu1 }
 0x21d   :  { %796 = vst [vmem:[#allocation9 + $0x98] sm:$0xff] %v1051_v12  ;;  %1064 = vtanh.f32 %v737_v13 }
 0x21e   :  { %v1053_v14 = vpop.eup %1052  ;;  %v998_v15 = vpop.f32.mrf.mxu1 }
 0x21f   :  { %795 = vst [vmem:[#allocation9 + $0x90] sm:$0xff] %v1053_v14  ;;  %1066 = vtanh.f32 %v998_v15 }
 0x220   :  { %v1055_v16 = vpop.eup %1054  ;;  %v747_v17 = vpop.f32.mrf.mxu1 }
 0x221   :  { %798 = vst [vmem:[#allocation9 + $0xa8] sm:$0xff] %v1055_v16  ;;  %1068 = vtanh.f32 %v747_v17 }
 0x222   :  { %v1057_v18 = vpop.eup %1056  ;;  %v1001_v19 = vpop.f32.mrf.mxu1 }
 0x223   :  { %797 = vst [vmem:[#allocation9 + $0xa0] sm:$0xff] %v1057_v18  ;;  %1070 = vtanh.f32 %v1001_v19 }
 0x224   :  { %v1059_v20 = vpop.eup %1058  ;;  %v757_v21 = vpop.f32.mrf.mxu1 }
 0x225   :  { %800 = vst [vmem:[#allocation9 + $0xb8] sm:$0xff] %v1059_v20  ;;  %1072 = vtanh.f32 %v757_v21 }
 0x226   :  { %v1061_v22 = vpop.eup %1060  ;;  %v1004_v23 = vpop.f32.mrf.mxu1 }
 0x227   :  { %799 = vst [vmem:[#allocation9 + $0xb0] sm:$0xff] %v1061_v22  ;;  %1074 = vtanh.f32 %v1004_v23 }
 0x228   :  { %v1063_v24 = vpop.eup %1062  ;;  %v767_v25 = vpop.f32.mrf.mxu1 }
 0x229   :  { %802 = vst [vmem:[#allocation9 + $0xc8] sm:$0xff] %v1063_v24  ;;  %1076 = vtanh.f32 %v767_v25 }
 0x22a   :  { %v1065_v26 = vpop.eup %1064 }
 0x22b   :  { %801 = vst [vmem:[#allocation9 + $0xc0] sm:$0xff] %v1065_v26 }
 0x22c   :  { %v1067_v27 = vpop.eup %1066 }
 0x22d   :  { %804 = vst [vmem:[#allocation9 + $0xd8] sm:$0xff] %v1067_v27 }
 0x22e   :  { %v1069_v28 = vpop.eup %1068 }
 0x22f   :  { %803 = vst [vmem:[#allocation9 + $0xd0] sm:$0xff] %v1069_v28 }
 0x230   :  { %v1071_v29 = vpop.eup %1070 }
 0x231   :  { %806 = vst [vmem:[#allocation9 + $0xe8] sm:$0xff] %v1071_v29 }
 0x232   :  { %v1073_v30 = vpop.eup %1072 }
 0x233   :  { %805 = vst [vmem:[#allocation9 + $0xe0] sm:$0xff] %v1073_v30 }
 0x234   :  { %v1075_v31 = vpop.eup %1074 }
 0x235   :  { %808 = vst [vmem:[#allocation9 + $0xf8] sm:$0xff] %v1075_v31 }
 0x236   :  { %v1077_v32 = vpop.eup %1076 }
 0x237   :  { %807 = vst [vmem:[#allocation9 + $0xf0] sm:$0xff] %v1077_v32 }
 0x238   :  { %1149 = shalt.err (!%p1146_p5)
}
 0x239   :  { %820 = dma.vmem_to_hbm [thread:$0]  %s815_s2, 4096, %s1326_s3, [#allocation5], %s1168_s22, %s1168_s22, %s1169_s23  }
 0x23a   :  { %1162 = dma.done.wait [#allocation5], 4096  }
 0x23b   :  { %1163 = vsyncadd [#allocation5], 4294963200 }
 0x23c   :  { %824 = vsyncpa [#allocation4], 1 }
 0x23d   :  { %825 = vsyncpa [#allocation7], 1 }
 0x23e   :  { %826 = vsyncpa [#allocation5], 1 }

</bundles_post_ra>
